<compile_context>
chip_gen: v6e
topology: v6e:2x2x1
jax: 0.10.0
libtpu: 0.0.40
codegen_flags: <defaults>
</compile_context>

<pallas_src>
import functools
import math

import jax
import jax.numpy as jnp
from jax import lax
from jax.experimental import pallas as pl
from jax.experimental.pallas import tpu as pltpu

_LANES = 128
_SUBLANES = 8
_NUM_CORES = 2           # leading "parallel" grid axis (megacore split on v7x)
_MAX_BLOCK_ROWS = 2048   # 2048 * 128 * 4B = 1 MiB per f32 input block


def _cdiv(a, b):
    return (a + b - 1) // b


def _round_up(a, b):
    return _cdiv(a, b) * b


def _to_slab(x):
    """Flatten and view as (rows, 128).

    Only the ragged tail (size % 128) is padded; the pad value is irrelevant
    because the kernel masks with the true element count.  For typical NCHW
    activations (H*W a multiple of 128) this is a copy-free reshape.
    """
    flat = x.reshape(-1)
    n = flat.shape[0]
    rem = n % _LANES
    if rem:
        flat = jnp.pad(flat, (0, _LANES - rem))
    return flat.reshape(-1, _LANES)


def _generator_loss_kernel(labels_ref, ip_ref, it_ref, fp_ref, ft_ref,
                           adv_ref, img_ref, flow_ref,
                           img_acc, flow_acc,
                           *, n_labels, n_img, n_flow,
                           block_rows, blocks_per_core):
    c = pl.program_id(0)                       # core-split axis ("parallel")
    i = pl.program_id(1)                       # row-block stream ("arbitrary")
    g = c * blocks_per_core + i                # global block index
    base = g * (block_rows * _LANES)           # flat element offset of block

    row_ids = lax.broadcasted_iota(jnp.int32, (block_rows, _LANES), 0)
    lane_ids = lax.broadcasted_iota(jnp.int32, (block_rows, _LANES), 1)
    flat_idx = base + row_ids * _LANES + lane_ids

    @pl.when(i == 0)
    def _init():
        img_acc[...] = jnp.zeros_like(img_acc)
        flow_acc[...] = jnp.zeros_like(flow_acc)
        # Adversarial term: elementwise (1 - label), masked to the true count.
        # Only core 0 contributes (the labels slab is tiny and resident).
        lab = labels_ref[...].astype(jnp.float32)
        lrow = lax.broadcasted_iota(jnp.int32, lab.shape, 0)
        llane = lax.broadcasted_iota(jnp.int32, lab.shape, 1)
        lmask = (lrow * _LANES + llane) < n_labels
        adv_ref[0] = jnp.where(jnp.logical_and(c == 0, lmask), 1.0 - lab, 0.0)

    def smooth_l1_partial(p_ref, t_ref, n_valid):
        # SmoothL1 (beta=1): 0.5*d^2 if |d| < 1 else |d| - 0.5
        d = p_ref[...].astype(jnp.float32) - t_ref[...].astype(jnp.float32)
        ad = jnp.abs(d)
        v = jnp.where(ad < 1.0, 0.5 * d * d, ad - 0.5)
        v = jnp.where(flat_idx < n_valid, v, 0.0)   # mask tail / overrun blocks
        # Fold sublane groups with pure VPU adds; keep an (8,128) vector partial.
        return jnp.sum(v.reshape(-1, _SUBLANES, _LANES), axis=0)

    img_acc[...] += smooth_l1_partial(ip_ref, it_ref, n_img)
    flow_acc[...] += smooth_l1_partial(fp_ref, ft_ref, n_flow)

    @pl.when(i == pl.num_programs(1) - 1)
    def _finalize():
        img_ref[0] = img_acc[...]
        flow_ref[0] = flow_acc[...]


def generator_loss(out_labels, out_imgs, target_imgs, out_flows, target_flows):
    n_labels = int(out_labels.size)
    n_img = int(out_imgs.size)
    n_flow = int(out_flows.size)

    labels = _to_slab(out_labels)
    ip = _to_slab(out_imgs)
    it = _to_slab(target_imgs)
    fp = _to_slab(out_flows)
    ft = _to_slab(target_flows)

    img_rows, flow_rows = ip.shape[0], fp.shape[0]
    lab_rows = labels.shape[0]

    block_rows = max(_SUBLANES,
                     min(_MAX_BLOCK_ROWS,
                         _round_up(max(img_rows, flow_rows), _SUBLANES)))
    n_img_blocks = _cdiv(img_rows, block_rows)
    n_flow_blocks = _cdiv(flow_rows, block_rows)
    num_blocks = max(n_img_blocks, n_flow_blocks)
    blocks_per_core = _cdiv(num_blocks, _NUM_CORES)

    def big_spec(n_blocks):
        def idx(c, i):
            # Clamp so the DMA stays in-bounds; out-of-range / tail elements
            # are zeroed by the in-kernel flat-index mask.
            return (jnp.minimum(c * blocks_per_core + i, n_blocks - 1), 0)
        return pl.BlockSpec((block_rows, _LANES), idx)

    in_specs = [
        pl.BlockSpec((lab_rows, _LANES), lambda c, i: (0, 0)),   # labels: resident
        big_spec(n_img_blocks), big_spec(n_img_blocks),
        big_spec(n_flow_blocks), big_spec(n_flow_blocks),
    ]
    out_shape = (
        jax.ShapeDtypeStruct((_NUM_CORES, lab_rows, _LANES), jnp.float32),
        jax.ShapeDtypeStruct((_NUM_CORES, _SUBLANES, _LANES), jnp.float32),
        jax.ShapeDtypeStruct((_NUM_CORES, _SUBLANES, _LANES), jnp.float32),
    )
    out_specs = (
        pl.BlockSpec((1, lab_rows, _LANES), lambda c, i: (c, 0, 0)),
        pl.BlockSpec((1, _SUBLANES, _LANES), lambda c, i: (c, 0, 0)),
        pl.BlockSpec((1, _SUBLANES, _LANES), lambda c, i: (c, 0, 0)),
    )
    scratch_shapes = [
        pltpu.VMEM((_SUBLANES, _LANES), jnp.float32),   # img loss accumulator
        pltpu.VMEM((_SUBLANES, _LANES), jnp.float32),   # flow loss accumulator
    ]

    streamed_bytes = sum(int(a.size) * a.dtype.itemsize
                         for a in (labels, ip, it, fp, ft))
    out_bytes = sum(math.prod(s.shape) * 4 for s in out_shape)
    cost = pl.CostEstimate(
        flops=5 * (n_img + n_flow) + 2 * n_labels,
        transcendentals=0,
        bytes_accessed=streamed_bytes + out_bytes,
    )

    kernel = functools.partial(
        _generator_loss_kernel,
        n_labels=n_labels, n_img=n_img, n_flow=n_flow,
        block_rows=block_rows, blocks_per_core=blocks_per_core,
    )

    adv_out, img_out, flow_out = pl.pallas_call(
        kernel,
        out_shape=out_shape,
        grid=(_NUM_CORES, blocks_per_core),
        in_specs=in_specs,
        out_specs=out_specs,
        scratch_shapes=scratch_shapes,
        compiler_params=pltpu.CompilerParams(
            dimension_semantics=("parallel", "arbitrary"),
            vmem_limit_bytes=32 * 1024 * 1024,
        ),
        cost_estimate=cost,
    )(labels, ip, it, fp, ft)

    # Tiny final reductions over the per-core vector partials (done in XLA).
    adversarial_loss = jnp.sum(adv_out) / n_labels
    imgs_loss = jnp.sum(img_out) / n_img
    flow_loss = jnp.sum(flow_out) / n_flow
    return 0.5 * imgs_loss + 0.5 * flow_loss + 0.001 * adversarial_loss


def _reference_loss(out_labels, out_imgs, target_imgs, out_flows, target_flows):
    def sm_l1(p, t):
        d = p - t
        ad = jnp.abs(d)
        return jnp.mean(jnp.where(ad < 1.0, 0.5 * d * d, ad - 0.5))

    adv = jnp.mean(1.0 - out_labels)
    return (0.5 * sm_l1(out_imgs, target_imgs)
            + 0.5 * sm_l1(out_flows, target_flows)
            + 0.001 * adv)


if __name__ == "__main__":
    key = jax.random.PRNGKey(0)
    k1, k2, k3, k4, k5 = jax.random.split(key, 5)

    batch = 2
    out_labels = jax.random.uniform(k1, (batch, 1), dtype=jnp.float32)          # discriminator scores
    out_imgs = jax.random.normal(k2, (batch, 3, 16, 16), dtype=jnp.float32)     # NCHW generated imgs
    target_imgs = jax.random.normal(k3, (batch, 3, 16, 16), dtype=jnp.float32)  # NCHW target imgs
    out_flows = jax.random.normal(k4, (batch, 2, 16, 16), dtype=jnp.float32)    # NCHW generated flows
    target_flows = jax.random.normal(k5, (batch, 2, 16, 16), dtype=jnp.float32) # NCHW target flows

    loss = jax.block_until_ready(
        generator_loss(out_labels, out_imgs, target_imgs, out_flows, target_flows))
    ref = _reference_loss(out_labels, out_imgs, target_imgs, out_flows, target_flows)
    assert jnp.allclose(loss, ref, rtol=1e-5, atol=1e-6), (loss, ref)

    # Second case: non-128-aligned flat sizes exercise the ragged-tail masking.
    k6, k7, k8, k9, k10 = jax.random.split(jax.random.PRNGKey(1), 5)
    out_labels2 = jax.random.uniform(k6, (3, 1), dtype=jnp.float32)
    out_imgs2 = jax.random.normal(k7, (3, 3, 20, 20), dtype=jnp.float32)
    target_imgs2 = jax.random.normal(k8, (3, 3, 20, 20), dtype=jnp.float32)
    out_flows2 = jax.random.normal(k9, (3, 2, 20, 20), dtype=jnp.float32)
    target_flows2 = jax.random.normal(k10, (3, 2, 20, 20), dtype=jnp.float32)

    loss2 = jax.block_until_ready(
        generator_loss(out_labels2, out_imgs2, target_imgs2, out_flows2, target_flows2))
    ref2 = _reference_loss(out_labels2, out_imgs2, target_imgs2, out_flows2, target_flows2)
    assert jnp.allclose(loss2, ref2, rtol=1e-5, atol=1e-6), (loss2, ref2)

    print("KERNEL_OK")
</pallas_src>

<mosaic_0001>
module attributes {stable_mosaic.version = 11 : i64} {
  func.func @_generator_loss_kernel(%arg0: i32, %arg1: i32, %arg2: memref<1x128xf32, #tpu.memory_space<vmem>>, %arg3: memref<16x128xf32, #tpu.memory_space<vmem>>, %arg4: memref<16x128xf32, #tpu.memory_space<vmem>>, %arg5: memref<16x128xf32, #tpu.memory_space<vmem>>, %arg6: memref<16x128xf32, #tpu.memory_space<vmem>>, %arg7: memref<1x1x128xf32, #tpu.memory_space<vmem>>, %arg8: memref<1x8x128xf32, #tpu.memory_space<vmem>>, %arg9: memref<1x8x128xf32, #tpu.memory_space<vmem>>, %arg10: memref<8x128xf32, #tpu.memory_space<vmem>>, %arg11: memref<8x128xf32, #tpu.memory_space<vmem>>) attributes {dimension_semantics = [#tpu.dimension_semantics<parallel>, #tpu.dimension_semantics<arbitrary>], iteration_bounds = array<i64: 2, 1>, scalar_prefetch = 0 : i64, scratch_operands = 2 : i64, tpu.core_type = #tpu.core_type<tc>, window_params = [{pipeline_mode = #tpu.pipeline_mode<synchronous>, transform_indices = @transform_0, window_bounds = array<i64: 1, 128>}, {transform_indices = @transform_1, window_bounds = array<i64: 16, 128>}, {transform_indices = @transform_2, window_bounds = array<i64: 16, 128>}, {transform_indices = @transform_3, window_bounds = array<i64: 16, 128>}, {transform_indices = @transform_4, window_bounds = array<i64: 16, 128>}, {transform_indices = @transform_5, window_bounds = array<i64: 1, 1, 128>}, {transform_indices = @transform_6, window_bounds = array<i64: 1, 8, 128>}, {transform_indices = @transform_7, window_bounds = array<i64: 1, 8, 128>}]} {
    %c1_i32 = arith.constant 1 : i32
    %0 = arith.muli %arg0, %c1_i32 : i32
    %1 = arith.addi %0, %arg1 : i32
    %c2048_i32 = arith.constant 2048 : i32
    %2 = arith.muli %1, %c2048_i32 : i32
    %3 = tpu.iota {dimensions = array<i32: 0>} : vector<16x128xi32>
    %4 = tpu.iota {dimensions = array<i32: 1>} : vector<16x128xi32>
    %c128_i32 = arith.constant 128 : i32
    %5 = vector.broadcast %c128_i32 : i32 to vector<16x128xi32>
    %6 = arith.muli %3, %5 : vector<16x128xi32>
    %7 = vector.broadcast %2 : i32 to vector<16x128xi32>
    %8 = arith.addi %7, %6 : vector<16x128xi32>
    %9 = arith.addi %8, %4 : vector<16x128xi32>
    %c0_i32 = arith.constant 0 : i32
    %10 = arith.cmpi eq, %arg1, %c0_i32 : i32
    %11 = arith.extui %10 : i1 to i32
    %c0_i32_0 = arith.constant 0 : i32
    %12 = arith.cmpi ne, %11, %c0_i32_0 : i32
    scf.if %12 {
      %cst_27 = arith.constant 0.000000e+00 : f32
      %58 = vector.broadcast %cst_27 : f32 to vector<8x128xf32>
      %c0_28 = arith.constant 0 : index
      %c0_29 = arith.constant 0 : index
      %59 = vector.load %arg10[%c0_28, %c0_29] : memref<8x128xf32, #tpu.memory_space<vmem>>, vector<8x128xf32>
      tpu.vector_store %arg10[%c0_28, %c0_29], %58 {strides = array<i32>} : memref<8x128xf32, #tpu.memory_space<vmem>>, vector<8x128xf32>,
      %cst_30 = arith.constant 0.000000e+00 : f32
      %60 = vector.broadcast %cst_30 : f32 to vector<8x128xf32>
      %c0_31 = arith.constant 0 : index
      %c0_32 = arith.constant 0 : index
      %61 = vector.load %arg11[%c0_31, %c0_32] : memref<8x128xf32, #tpu.memory_space<vmem>>, vector<8x128xf32>
      tpu.vector_store %arg11[%c0_31, %c0_32], %60 {strides = array<i32>} : memref<8x128xf32, #tpu.memory_space<vmem>>, vector<8x128xf32>,
      %c0_33 = arith.constant 0 : index
      %c0_34 = arith.constant 0 : index
      %62 = vector.load %arg2[%c0_33, %c0_34] : memref<1x128xf32, #tpu.memory_space<vmem>>, vector<1x128xf32>
      %63 = tpu.iota {dimensions = array<i32: 0>} : vector<1x128xi32>
      %64 = tpu.iota {dimensions = array<i32: 1>} : vector<1x128xi32>
      %c128_i32_35 = arith.constant 128 : i32
      %65 = vector.broadcast %c128_i32_35 : i32 to vector<1x128xi32>
      %66 = arith.muli %63, %65 : vector<1x128xi32>
      %67 = arith.addi %66, %64 : vector<1x128xi32>
      %c2_i32 = arith.constant 2 : i32
      %68 = vector.broadcast %c2_i32 : i32 to vector<1x128xi32>
      %69 = arith.cmpi slt, %67, %68 : vector<1x128xi32>
      %c0_i32_36 = arith.constant 0 : i32
      %70 = arith.cmpi eq, %arg0, %c0_i32_36 : i32
      %71 = vector.broadcast %70 : i1 to vector<1x128xi1>
      %72 = arith.andi %71, %69 : vector<1x128xi1>
      %cst_37 = arith.constant 1.000000e+00 : f32
      %73 = vector.broadcast %cst_37 : f32 to vector<1x128xf32>
      %74 = arith.subf %73, %62 : vector<1x128xf32>
      %cst_38 = arith.constant 0.000000e+00 : f32
      %75 = vector.broadcast %cst_38 : f32 to vector<1x128xf32>
      %76 = arith.select %72, %74, %75 : vector<1x128xi1>, vector<1x128xf32>
      %c0_39 = arith.constant 0 : index
      %c0_40 = arith.constant 0 : index
      %c0_41 = arith.constant 0 : index
      %77 = vector.load %arg7[%c0_39, %c0_40, %c0_41] : memref<1x1x128xf32, #tpu.memory_space<vmem>>, vector<1x1x128xf32>
      %78 = vector.shape_cast %77 : vector<1x1x128xf32> to vector<1x128xf32>
      %79 = vector.shape_cast %76 : vector<1x128xf32> to vector<1x1x128xf32>
      tpu.vector_store %arg7[%c0_39, %c0_40, %c0_41], %79 {strides = array<i32>} : memref<1x1x128xf32, #tpu.memory_space<vmem>>, vector<1x1x128xf32>,
    } else {
    }
    %c0 = arith.constant 0 : index
    %c0_1 = arith.constant 0 : index
    %13 = vector.load %arg10[%c0, %c0_1] : memref<8x128xf32, #tpu.memory_space<vmem>>, vector<8x128xf32>
    %c0_2 = arith.constant 0 : index
    %c0_3 = arith.constant 0 : index
    %14 = vector.load %arg3[%c0_2, %c0_3] : memref<16x128xf32, #tpu.memory_space<vmem>>, vector<16x128xf32>
    %c0_4 = arith.constant 0 : index
    %c0_5 = arith.constant 0 : index
    %15 = vector.load %arg4[%c0_4, %c0_5] : memref<16x128xf32, #tpu.memory_space<vmem>>, vector<16x128xf32>
    %16 = arith.subf %14, %15 : vector<16x128xf32>
    %17 = math.absf %16 : vector<16x128xf32>
    %cst = arith.constant 1.000000e+00 : f32
    %18 = vector.broadcast %cst : f32 to vector<16x128xf32>
    %19 = arith.cmpf olt, %17, %18 : vector<16x128xf32>
    %cst_6 = arith.constant 5.000000e-01 : f32
    %20 = vector.broadcast %cst_6 : f32 to vector<16x128xf32>
    %21 = arith.mulf %20, %16 : vector<16x128xf32>
    %22 = arith.mulf %21, %16 : vector<16x128xf32>
    %cst_7 = arith.constant 5.000000e-01 : f32
    %23 = vector.broadcast %cst_7 : f32 to vector<16x128xf32>
    %24 = arith.subf %17, %23 : vector<16x128xf32>
    %25 = arith.select %19, %22, %24 : vector<16x128xi1>, vector<16x128xf32>
    %c1536_i32 = arith.constant 1536 : i32
    %26 = vector.broadcast %c1536_i32 : i32 to vector<16x128xi32>
    %27 = arith.cmpi slt, %9, %26 : vector<16x128xi32>
    %cst_8 = arith.constant 0.000000e+00 : f32
    %28 = vector.broadcast %cst_8 : f32 to vector<16x128xf32>
    %29 = arith.select %27, %25, %28 : vector<16x128xi1>, vector<16x128xf32>
    %30 = vector.shape_cast %29 : vector<16x128xf32> to vector<2x8x128xf32>
    %cst_9 = arith.constant dense<0.000000e+00> : vector<8x128xf32>
    %31 = vector.multi_reduction <add>, %30, %cst_9 [0] : vector<2x8x128xf32> to vector<8x128xf32>
    %32 = arith.addf %13, %31 : vector<8x128xf32>
    %c0_10 = arith.constant 0 : index
    %c0_11 = arith.constant 0 : index
    %33 = vector.load %arg10[%c0_10, %c0_11] : memref<8x128xf32, #tpu.memory_space<vmem>>, vector<8x128xf32>
    tpu.vector_store %arg10[%c0_10, %c0_11], %32 {strides = array<i32>} : memref<8x128xf32, #tpu.memory_space<vmem>>, vector<8x128xf32>,
    %c0_12 = arith.constant 0 : index
    %c0_13 = arith.constant 0 : index
    %34 = vector.load %arg11[%c0_12, %c0_13] : memref<8x128xf32, #tpu.memory_space<vmem>>, vector<8x128xf32>
    %c0_14 = arith.constant 0 : index
    %c0_15 = arith.constant 0 : index
    %35 = vector.load %arg5[%c0_14, %c0_15] : memref<16x128xf32, #tpu.memory_space<vmem>>, vector<16x128xf32>
    %c0_16 = arith.constant 0 : index
    %c0_17 = arith.constant 0 : index
    %36 = vector.load %arg6[%c0_16, %c0_17] : memref<16x128xf32, #tpu.memory_space<vmem>>, vector<16x128xf32>
    %37 = arith.subf %35, %36 : vector<16x128xf32>
    %38 = math.absf %37 : vector<16x128xf32>
    %cst_18 = arith.constant 1.000000e+00 : f32
    %39 = vector.broadcast %cst_18 : f32 to vector<16x128xf32>
    %40 = arith.cmpf olt, %38, %39 : vector<16x128xf32>
    %cst_19 = arith.constant 5.000000e-01 : f32
    %41 = vector.broadcast %cst_19 : f32 to vector<16x128xf32>
    %42 = arith.mulf %41, %37 : vector<16x128xf32>
    %43 = arith.mulf %42, %37 : vector<16x128xf32>
    %cst_20 = arith.constant 5.000000e-01 : f32
    %44 = vector.broadcast %cst_20 : f32 to vector<16x128xf32>
    %45 = arith.subf %38, %44 : vector<16x128xf32>
    %46 = arith.select %40, %43, %45 : vector<16x128xi1>, vector<16x128xf32>
    %c1024_i32 = arith.constant 1024 : i32
    %47 = vector.broadcast %c1024_i32 : i32 to vector<16x128xi32>
    %48 = arith.cmpi slt, %9, %47 : vector<16x128xi32>
    %cst_21 = arith.constant 0.000000e+00 : f32
    %49 = vector.broadcast %cst_21 : f32 to vector<16x128xf32>
    %50 = arith.select %48, %46, %49 : vector<16x128xi1>, vector<16x128xf32>
    %51 = vector.shape_cast %50 : vector<16x128xf32> to vector<2x8x128xf32>
    %cst_22 = arith.constant dense<0.000000e+00> : vector<8x128xf32>
    %52 = vector.multi_reduction <add>, %51, %cst_22 [0] : vector<2x8x128xf32> to vector<8x128xf32>
    %53 = arith.addf %34, %52 : vector<8x128xf32>
    %c0_23 = arith.constant 0 : index
    %c0_24 = arith.constant 0 : index
    %54 = vector.load %arg11[%c0_23, %c0_24] : memref<8x128xf32, #tpu.memory_space<vmem>>, vector<8x128xf32>
    tpu.vector_store %arg11[%c0_23, %c0_24], %53 {strides = array<i32>} : memref<8x128xf32, #tpu.memory_space<vmem>>, vector<8x128xf32>,
    %c0_i32_25 = arith.constant 0 : i32
    %55 = arith.cmpi eq, %arg1, %c0_i32_25 : i32
    %56 = arith.extui %55 : i1 to i32
    %c0_i32_26 = arith.constant 0 : i32
    %57 = arith.cmpi ne, %56, %c0_i32_26 : i32
    scf.if %57 {
      %c0_27 = arith.constant 0 : index
      %c0_28 = arith.constant 0 : index
      %58 = vector.load %arg10[%c0_27, %c0_28] : memref<8x128xf32, #tpu.memory_space<vmem>>, vector<8x128xf32>
      %c0_29 = arith.constant 0 : index
      %c0_30 = arith.constant 0 : index
      %c0_31 = arith.constant 0 : index
      %59 = vector.load %arg8[%c0_29, %c0_30, %c0_31] : memref<1x8x128xf32, #tpu.memory_space<vmem>>, vector<1x8x128xf32>
      %60 = vector.shape_cast %59 : vector<1x8x128xf32> to vector<8x128xf32>
      %61 = vector.shape_cast %58 : vector<8x128xf32> to vector<1x8x128xf32>
      tpu.vector_store %arg8[%c0_29, %c0_30, %c0_31], %61 {strides = array<i32>} : memref<1x8x128xf32, #tpu.memory_space<vmem>>, vector<1x8x128xf32>,
      %c0_32 = arith.constant 0 : index
      %c0_33 = arith.constant 0 : index
      %62 = vector.load %arg11[%c0_32, %c0_33] : memref<8x128xf32, #tpu.memory_space<vmem>>, vector<8x128xf32>
      %c0_34 = arith.constant 0 : index
      %c0_35 = arith.constant 0 : index
      %c0_36 = arith.constant 0 : index
      %63 = vector.load %arg9[%c0_34, %c0_35, %c0_36] : memref<1x8x128xf32, #tpu.memory_space<vmem>>, vector<1x8x128xf32>
      %64 = vector.shape_cast %63 : vector<1x8x128xf32> to vector<8x128xf32>
      %65 = vector.shape_cast %62 : vector<8x128xf32> to vector<1x8x128xf32>
      tpu.vector_store %arg9[%c0_34, %c0_35, %c0_36], %65 {strides = array<i32>} : memref<1x8x128xf32, #tpu.memory_space<vmem>>, vector<1x8x128xf32>,
    } else {
    }
    return
  }
  func.func @transform_0(%arg0: i32, %arg1: i32) -> (i32, i32) {
    %c0_i32 = arith.constant 0 : i32
    %c0_i32_0 = arith.constant 0 : i32
    %c0_i32_1 = arith.constant 0 : i32
    return %c0_i32, %c0_i32_0 : i32, i32
  }
  func.func @transform_1(%arg0: i32, %arg1: i32) -> (i32, i32) {
    %c1_i32 = arith.constant 1 : i32
    %0 = arith.muli %arg0, %c1_i32 : i32
    %1 = arith.addi %0, %arg1 : i32
    %c0_i32 = arith.constant 0 : i32
    %2 = arith.minsi %1, %c0_i32 : i32
    %c0_i32_0 = arith.constant 0 : i32
    %c0_i32_1 = arith.constant 0 : i32
    return %2, %c0_i32_0 : i32, i32
  }
  func.func @transform_2(%arg0: i32, %arg1: i32) -> (i32, i32) {
    %c1_i32 = arith.constant 1 : i32
    %0 = arith.muli %arg0, %c1_i32 : i32
    %1 = arith.addi %0, %arg1 : i32
    %c0_i32 = arith.constant 0 : i32
    %2 = arith.minsi %1, %c0_i32 : i32
    %c0_i32_0 = arith.constant 0 : i32
    %c0_i32_1 = arith.constant 0 : i32
    return %2, %c0_i32_0 : i32, i32
  }
  func.func @transform_3(%arg0: i32, %arg1: i32) -> (i32, i32) {
    %c1_i32 = arith.constant 1 : i32
    %0 = arith.muli %arg0, %c1_i32 : i32
    %1 = arith.addi %0, %arg1 : i32
    %c0_i32 = arith.constant 0 : i32
    %2 = arith.minsi %1, %c0_i32 : i32
    %c0_i32_0 = arith.constant 0 : i32
    %c0_i32_1 = arith.constant 0 : i32
    return %2, %c0_i32_0 : i32, i32
  }
  func.func @transform_4(%arg0: i32, %arg1: i32) -> (i32, i32) {
    %c1_i32 = arith.constant 1 : i32
    %0 = arith.muli %arg0, %c1_i32 : i32
    %1 = arith.addi %0, %arg1 : i32
    %c0_i32 = arith.constant 0 : i32
    %2 = arith.minsi %1, %c0_i32 : i32
    %c0_i32_0 = arith.constant 0 : i32
    %c0_i32_1 = arith.constant 0 : i32
    return %2, %c0_i32_0 : i32, i32
  }
  func.func @transform_5(%arg0: i32, %arg1: i32) -> (i32, i32, i32) {
    %c0_i32 = arith.constant 0 : i32
    %c0_i32_0 = arith.constant 0 : i32
    %c0_i32_1 = arith.constant 0 : i32
    return %arg0, %c0_i32, %c0_i32_0 : i32, i32, i32
  }
  func.func @transform_6(%arg0: i32, %arg1: i32) -> (i32, i32, i32) {
    %c0_i32 = arith.constant 0 : i32
    %c0_i32_0 = arith.constant 0 : i32
    %c0_i32_1 = arith.constant 0 : i32
    return %arg0, %c0_i32, %c0_i32_0 : i32, i32, i32
  }
  func.func @transform_7(%arg0: i32, %arg1: i32) -> (i32, i32, i32) {
    %c0_i32 = arith.constant 0 : i32
    %c0_i32_0 = arith.constant 0 : i32
    %c0_i32_1 = arith.constant 0 : i32
    return %arg0, %c0_i32, %c0_i32_0 : i32, i32, i32
  }
}

</mosaic_0001>

<bundles_post_ra>
// kernel: tpu_custom_call.1
= control target key start
LH: loop header
LB: loop body
LE: loop exit
PB: predicated region body
PF: predicated region fallthrough
CT: control target
= control target key end

     0   :  { %s1734_s0 = inlined_call_operand.hbm [shape: f32[1,128], index: 0, kind: input, shape index: {}]   ;;  %s1735_s1 = inlined_call_operand.hbm [shape: f32[12,128], index: 1, kind: input, shape index: {}]   ;;  %s1736_s2 = inlined_call_operand.hbm [shape: f32[12,128], index: 2, kind: input, shape index: {}]   ;;  %s1737_s3 = inlined_call_operand.hbm [shape: f32[8,128], index: 3, kind: input, shape index: {}]   ;;  %s1738_s4 = inlined_call_operand.hbm [shape: f32[8,128], index: 4, kind: input, shape index: {}]   ;;  %s1739_s5 = inlined_call_operand.hbm [shape: f32[2,1,128], index: 5, kind: output, shape index: {0}]   ;;  %s1740_s6 = inlined_call_operand.hbm [shape: f32[2,8,128], index: 6, kind: output, shape index: {1}]   ;;  %s1741_s7 = inlined_call_operand.hbm [shape: f32[2,8,128], index: 7, kind: output, shape index: {2}]  }
   0x1   :  { %1753 = sst [smem:[#allocation28_spill]] %s1734_s0 }
   0x2   :  { %13 = vsyncpa [#allocation5], 0 }
   0x3   :  { %14 = vsyncpa [#allocation8], 0 }
   0x4   :  { %16 = vsyncpa [#allocation8 + $0x1], 0 }
   0x5   :  { %17 = vsyncpa [#allocation11], 0 }
   0x6   :  { %19 = vsyncpa [#allocation11 + $0x1], 0 }
   0x7   :  { %20 = vsyncpa [#allocation6], 0 }
   0x8   :  { %22 = vsyncpa [#allocation6 + $0x1], 0 }
   0x9   :  { %23 = vsyncpa [#allocation15], 0 }
   0xa   :  { %25 = vsyncpa [#allocation15 + $0x1], 0  ;;  %s1382_s24 = smov 0   ;;  %s1384_s25 = smov 0  }
   0xb   :  { %s1386_s26 = smov 0   ;;  %s1388_s27 = smov 0  }
   0xc   :  { %s1390_s28 = smov 0   ;;  %s1392_s29 = smov 0  }
   0xd   :  { %s1394_s30 = smov 0   ;;  %s1396_s8 = smov 0  }
   0xe LB: > { %1754 = sst [smem:[#allocation22_spill]] %s1306_s26  ;;  %s1421_s9 = sadd.s32 4294967295, %s1326_s8   ;;  %s1326_s8 = sphi %s1396_s8, %s31_s8   ;;  %s1322_s30 = sphi %s1394_s30, %s1782_s30   ;;  %s1318_s29 = sphi %s1392_s29, %s1781_s29   ;;  %s1314_s28 = sphi %s1390_s28, %s1724_s28   ;;  %s1310_s27 = sphi %s1388_s27, %s1785_s27   ;;  %s1306_s26 = sphi %s1386_s26, %s1780_s26   ;;  %s1302_s25 = sphi %s1384_s25, %s1784_s25   ;;  %s1298_s24 = sphi %s1382_s24, %s1783_s24  }
   0xf   : > { %1755 = sst [smem:[#allocation23_spill]] %s1322_s30  ;;  %s1744_s10 = sadd.s32 4294967294, %s1326_s8  }
  0x10   : > { %1756 = sst [smem:[#allocation24_spill]] %s1326_s8  ;;  %s43_s11 = sadd.s32 1, %s1322_s30 }
  0x11   : > { %p45_p0 = scmp.ge.s32.totalorder %s43_s11, 2  ;;  %p1295_p1 = scmp.ne.s32.totalorder %s1314_s28, 0 }
  0x12   : > { %p85_p2 = scmp.eq.s32.totalorder %s1326_s8, 0  ;;  %p90_p3 = scmp.ne.s32.totalorder %s1314_s28, %s1310_s27 }
  0x13   : > { %s1787_s11 = smov (%p45_p0, %s43_s11), 0  ;;  %p1748_p5 = scmp.eq.s32.totalorder %s1421_s9, 0 }
  0x14   : > { %1757 = sst [smem:[#allocation25_spill]] %s1787_s11  ;;  %p1430_p4 = por %p1295_p1, %p85_p2 }
  0x15   : > { %p1437_p6 = por %p1748_p5, %p90_p3  ;;  %s196_s14 = ssub.s32 %s1322_s30, %s1787_s11 }
  0x16   : > { %p197_p7 = scmp.eq.s32.totalorder %s196_s14, 0  ;;  %s199_s15 = sadd.s32 1, %s1306_s26 }
  0x17   : > { %s1759_s13 = scalar_select %p1437_p6, 1, 0 }
  0x18   : > { %s1445_s16 = scalar_select %p197_p7, %s1306_s26, %s199_s15  }
  0x19   : > { %p209_p8 = scmp.ne.s32.totalorder %s1306_s26, %s1302_s25  ;;  %p210_p9 = scmp.eq.s32.totalorder %s1421_s9, 1 }
  0x1a   : > { %1760 = sst [smem:[#allocation26_spill]] %s1445_s16  ;;  %p215_p10 = scmp.ne.s32.totalorder %s1302_s25, %s1298_s24 }
  0x1b   : > { %p216_p11 = scmp.eq.s32.totalorder %s1744_s10, 1  ;;  %p1454_p12 = por %p210_p9, %p209_p8 }
  0x1c   : > { %p868_p13 = scmp.ge.s32.totalorder %s1326_s8, 1  ;;  %p275_p1 = scmp.lt.s32.totalorder %s1326_s8, 3 }
  0x1d   : > { %s1761_s17 = scalar_select %p1454_p12, 1, 0 }
  0x1e   : > { %p1459_p0 = por %p216_p11, %p215_p10  ;;  %p1464_p2 = pnand %p868_p13, %p275_p1 }
  0x1f   : > { %s1328_s20 = smov [#allocation4]  }
  0x20   : > { %s1762_s18 = scalar_select %p1459_p0, 1, 0 }
  0x21   : > { %s288_s21 = sshll.u32 %s1328_s20, 4  ;;  %p931_p3 = pneg %p1464_p2  ;;  %s289_s21 = int_to_ptr.vmem [resolvable:$true] %s288_s21 }
  0x22   : > { %1763 = sst [smem:[#allocation27_spill]] %s1762_s18  ;;  %s1038_s22 = scalar_lea.vmem %s289_s21, 16 }
  0x23   : > { %p932_p7 = pnand %p931_p3, %p1748_p5  ;;  %p1039_p9 = scmp.ne.s32.totalorder %s289_s21, %s1038_s22 }
  0x24   : > { %s1045_s23 = scalar_lea.vmem %s289_s21, 32  ;;  %p1046_p0 = scmp.lt.s32.totalorder %s289_s21, %s289_s21 }
  0x25   : > { %p1029_p8 = pneg %p932_p7  ;;  %p1047_p12 = scmp.lt.s32.totalorder %s1045_s23, %s1038_s22 }
  0x27   : > { %p1041_p10 = pnand %p1039_p9, %p1029_p8  ;;  %p1048_p13 = por %p1047_p12, %p1046_p0 }
  0x29   : > { %p1042_p11 = pneg %p1041_p10 }
  0x2b   : > { %p1049_p1 = pnand %p1048_p13, %p1042_p11 }
  0x2d   : > { %1052 = shalt.err (!%p1049_p1)
}
  0x2e   : > { %s1765_s0 = sld [smem:[#allocation28_spill]]  ;;  %p1747_p6 = scmp.ge.s32.totalorder %s1326_s8, 2 }
  0x2f   : > { %s1479_s15 = sand.u32 (!%p1747_p6), 1, %s1326_s8   ;;  %s1329_s20 = smov (!%p1747_p6), [#allocation7]  }
  0x30   : > { %295 = sbr.rel (%p1747_p6) target bundleno = 139 (0x8b), region = 20  ;;  %s313_s10 = sshll.u32 (!%p1747_p6), %s1329_s20, 4  ;;  %s314_s10 = int_to_ptr.vmem [resolvable:$true] %s313_s10 }
  0x31   : > { %s300_s22 = scalar_lea.sflag (!%p1747_p6), [#allocation8], %s1479_s15  ;;  %s1053_s30 = scalar_lea.hbm (!%p1747_p6), %s1735_s1, 256 }
  0x32   : > { %p1054_p12 = scmp.ne.s32.totalorder (!%p1747_p6), %s1735_s1, %s1053_s30 }
  0x34   : > { %934 = dma.hbm_to_vmem [thread:$0]  (!%p932_p7), %s1765_s0, 16, %s289_s21, [#allocation5]  }
  0x35   : > { %p1055_p0 = pnand %p1054_p12, %p1430_p4  ;;  %p1059_p7 = scmp.lt.s32.totalorder %s1053_s30, %s1053_s30 }
  0x37   : > { %p1056_p3 = pneg %p1055_p0 }
  0x39   : > { %p1061_p8 = pnand %p1059_p7, %p1056_p3 }
  0x3b   : > { %1064 = shalt.err (!%p1061_p8)
}
  0x3c   : > { %s1065_s14 = scalar_lea.vmem %s314_s10, 256  ;;  %s1071_s20 = scalar_lea.vmem %s314_s10, 512 }
  0x3d   : > { %p1066_p9 = scmp.ne.s32.totalorder %s314_s10, %s1065_s14  ;;  %p1072_p13 = scmp.lt.s32.totalorder %s314_s10, %s314_s10 }
  0x3e   : > { %p1073_p1 = scmp.lt.s32.totalorder %s1071_s20, %s1065_s14 }
  0x3f   : > { %p1067_p10 = pnand %p1066_p9, %p1430_p4 }
  0x40   : > { %p1074_p6 = por %p1073_p1, %p1072_p13 }
  0x41   : > { %p1068_p11 = pneg %p1067_p10 }
  0x43   : > { %p1075_p5 = pnand %p1074_p6, %p1068_p11 }
  0x45   : > { %1078 = shalt.err (!%p1075_p5)
}
  0x46   : > { %s1330_s11 = smov 128   ;;  %s1331_s23 = smov 8  }
  0x47   : > { %917 = dma.hbm_to_vmem [thread:$0]  (%p1430_p4), %s1735_s1, 256, %s314_s10, %s300_s22, %s1330_s11, %s1330_s11, %s1331_s23  }
  0x48   : > { %s1332_s21 = smov [#allocation9]   ;;  %s1079_s14 = scalar_lea.hbm %s1736_s2, 256 }
  0x49   : > { %s337_s0 = sshll.u32 %s1332_s21, 4  ;;  %p1080_p5 = scmp.ne.s32.totalorder %s1736_s2, %s1079_s14  ;;  %s338_s0 = int_to_ptr.vmem [resolvable:$true] %s337_s0 }
  0x4a   : > { %p1085_p0 = scmp.lt.s32.totalorder %s1079_s14, %s1079_s14 }
  0x4b   : > { %p1081_p6 = pnand %p1080_p5, %p1430_p4 }
  0x4d   : > { %p1082_p12 = pneg %p1081_p6 }
  0x4f   : > { %p1087_p3 = pnand %p1085_p0, %p1082_p12 }
  0x51   : > { %1090 = shalt.err (!%p1087_p3)
}
  0x52   : > { %s1091_s18 = scalar_lea.vmem %s338_s0, 256  ;;  %s1097_s10 = scalar_lea.vmem %s338_s0, 512 }
  0x53   : > { %p1092_p7 = scmp.ne.s32.totalorder %s338_s0, %s1091_s18  ;;  %p1098_p10 = scmp.lt.s32.totalorder %s338_s0, %s338_s0 }
  0x54   : > { %p1099_p11 = scmp.lt.s32.totalorder %s1097_s10, %s1091_s18 }
  0x55   : > { %p1093_p8 = pnand %p1092_p7, %p1430_p4 }
  0x56   : > { %p1100_p13 = por %p1099_p11, %p1098_p10 }
  0x57   : > { %p1094_p9 = pneg %p1093_p8 }
  0x59   : > { %p1101_p1 = pnand %p1100_p13, %p1094_p9 }
  0x5b   : > { %1104 = shalt.err (!%p1101_p1)
}
  0x5c   : > { %918 = dma.hbm_to_vmem [thread:$0]  (%p1430_p4), %s1736_s2, 256, %s338_s0, %s300_s22, %s1330_s11, %s1330_s11, %s1331_s23  }
  0x5d   : > { %346 = sbr.rel (!%p1430_p4) target bundleno = 116 (0x74), region = 32  ;;  %s348_s16 = scalar_lea.sflag (%p1430_p4), [#allocation11], %s1479_s15 }
  0x62   : > { %360 = vsyncadd %s348_s16, 128  ;;  %s1333_s30 = smov [#allocation10]   ;;  %s1105_s14 = scalar_lea.hbm %s1737_s3, 128 }
  0x63   : > { %s365_s27 = sshll.u32 %s1333_s30, 4  ;;  %p1106_p5 = scmp.ne.s32.totalorder %s1737_s3, %s1105_s14  ;;  %s366_s27 = int_to_ptr.vmem [resolvable:$true] %s365_s27 }
  0x64   : > { %p1111_p6 = scmp.lt.s32.totalorder %s1105_s14, %s1105_s14 }
  0x66   : > { %p1113_p12 = pnand %p1111_p6, %p1106_p5 }
  0x68   : > { %1116 = shalt.err (!%p1113_p12)
}
  0x69   : > { %s1117_s0 = scalar_lea.vmem %s366_s27, 128  ;;  %s1123_s22 = scalar_lea.vmem %s366_s27, 512 }
  0x6a   : > { %p1118_p0 = scmp.ne.s32.totalorder %s366_s27, %s1117_s0  ;;  %p1124_p3 = scmp.lt.s32.totalorder %s366_s27, %s366_s27 }
  0x6b   : > { %p1125_p7 = scmp.lt.s32.totalorder %s1123_s22, %s1117_s0 }
  0x6d   : > { %p1126_p8 = por %p1125_p7, %p1124_p3 }
  0x6f   : > { %p1127_p9 = pnand %p1126_p8, %p1118_p0 }
  0x71   : > { %1130 = shalt.err (!%p1127_p9)
}
  0x72   : > { %s1334_s11 = smov 128   ;;  %s1335_s23 = smov 8  }
  0x73   : > { %371 = dma.hbm_to_vmem [thread:$0]  %s1737_s3, 128, %s366_s27, %s348_s16, %s1334_s11, %s1334_s11, %s1335_s23  }
  0x74 PF: > { %374 = sbr.rel (!%p1430_p4) target bundleno = 139 (0x8b), region = 36  ;;  %s376_s30 = scalar_lea.sflag (%p1430_p4), [#allocation11], %s1479_s15 }
  0x79   : > { %388 = vsyncadd %s376_s30, 128  ;;  %s1336_s18 = smov [#allocation12]   ;;  %s1131_s10 = scalar_lea.hbm %s1738_s4, 128 }
  0x7a   : > { %s393_s21 = sshll.u32 %s1336_s18, 4  ;;  %p1132_p10 = scmp.ne.s32.totalorder %s1738_s4, %s1131_s10  ;;  %s394_s21 = int_to_ptr.vmem [resolvable:$true] %s393_s21 }
  0x7b   : > { %p1137_p11 = scmp.lt.s32.totalorder %s1131_s10, %s1131_s10 }
  0x7d   : > { %p1139_p13 = pnand %p1137_p11, %p1132_p10 }
  0x7f   : > { %1142 = shalt.err (!%p1139_p13)
}
  0x80   : > { %s1143_s16 = scalar_lea.vmem %s394_s21, 128  ;;  %s1149_s12 = scalar_lea.vmem %s394_s21, 512 }
  0x81   : > { %p1144_p1 = scmp.ne.s32.totalorder %s394_s21, %s1143_s16  ;;  %p1150_p4 = scmp.lt.s32.totalorder %s394_s21, %s394_s21 }
  0x82   : > { %p1151_p5 = scmp.lt.s32.totalorder %s1149_s12, %s1143_s16 }
  0x84   : > { %p1152_p6 = por %p1151_p5, %p1150_p4 }
  0x86   : > { %p1153_p12 = pnand %p1152_p6, %p1144_p1 }
  0x88   : > { %1156 = shalt.err (!%p1153_p12)
}
  0x89   : > { %s1337_s15 = smov 128   ;;  %s1338_s27 = smov 8  }
  0x8a   : > { %399 = dma.hbm_to_vmem [thread:$0]  %s1738_s4, 128, %s394_s21, %s376_s30, %s1337_s15, %s1337_s15, %s1338_s27  }
  0x8b PF: > { %405 = sbr.rel (%p1464_p2) target bundleno = 229 (0xe5), region = 40  ;;  %p1766_p0 = scmp.eq.s32.totalorder (!%p1464_p2), %s1421_s9, 0 }
  0x90   : > { %1272 = dma.done.wait (%p1766_p0), [#allocation5], 16   ;;  %p1767_p3 = pmov %p1766_p0 }
  0x91   : > { %s1547_s26 = sand.u32 1, %s1421_s9   ;;  %s413_s8 = sand.u32 1, %s1314_s28  }
  0x92   : > { %1274 = vsyncadd (%p1767_p3), [#allocation5], 4294967280  ;;  %s1550_s18 = sshll.u32 %s413_s8, 4  ;;  %s412_s30 = scalar_lea.sflag [#allocation8], %s1547_s26 }
  0x93   : > { %s415_s21 = scalar_lea.vmem [#allocation7], %s1550_s18  ;;  %p1768_p7 = scmp.ne.s32.totalorder %s1759_s13, 0 }
  0x95   : > { %1276 = dma.done.wait (%p1768_p7), %s412_s30, 512  }
  0x96   : > { %1278 = vsyncadd (%p1768_p7), %s412_s30, 4294966784  ;;  %s424_s19 = scalar_lea.vmem [#allocation9], %s1550_s18  ;;  %s430_s14 = scalar_lea.sflag [#allocation11], %s1547_s26 }
  0x97   : > { %s433_s9 = scalar_lea.vmem [#allocation10], %s1550_s18 }
  0x98   : > { %1280 = dma.done.wait (%p1768_p7), %s430_s14, 512  }
  0x99   : > { %1282 = vsyncadd (%p1768_p7), %s430_s14, 4294966784  ;;  %s899_s20 = sshll.u32 %s1318_s29, 11  ;;  %v519_v0 = vlaneseq  ;;  %s1567_s10 = sand.u32 1, %s1302_s25   ;;  %v549_v9 = vld [vmem:[%s415_s21] sm:$0xff]  ;;  %v550_v10 = vld [vmem:[%s415_s21 + $0x8] sm:$0xff] }
  0x9a   : > { %p540_p2 = scmp.eq.s32.totalorder %s1318_s29, 0  ;;  %v526_v2 = vstv %s899_s20  ;;  %s897_s0 = sshll.u32 %s1567_s10, 3  ;;  %v551_v11 = vld [vmem:[%s424_s19] sm:$0xff]  ;;  %v552_v15 = vld [vmem:[%s424_s19 + $0x8] sm:$0xff] }
  0x9b   : > { %v520_v1 = vshrl.u32 %v519_v0, 7  ;;  %v523_v4 = vand.u32 127, %v519_v0  ;;  %s482_s13 = scalar_lea.vmem [#allocation13], %s1567_s10  ;;  %v553_v16 = vsub.f32 %v549_v9, %v551_v11  ;;  %v537_v17 = vld [vmem:[#allocation4] sm:$0x1]  ;;  %v575_v18 = vld [vmem:[%s433_s9] sm:$0xff]  ;;  %v554_v19 = vsub.f32 %v550_v10, %v552_v15 }
  0x9c   : > { %s541_s22 = scalar_select %p540_p2, 1, 0  ;;  %v545_v20 = vsub.f32 1.0, %v537_v17  ;;  %v576_v21 = vld [vmem:[%s433_s9 + $0x8] sm:$0xff] }
  0x9d   : > { %v521_v3 = vadd.s32 8, %v520_v1  ;;  %v524_v5 = vmul.u32 128, %v520_v1  ;;  %s630_s16 = sshll.u32 %s482_s13, 4  ;;  %s442_s12 = scalar_lea.vmem [#allocation12], %s1550_s18  ;;  %v555_v25 = vand.u32 2147483647, %v553_v16  ;;  %s1578_s16 = int_to_ptr.vmem [resolvable:$true] %s630_s16 }
  0x9e   : > { %v542_v12 = vstv %s541_s22  ;;  %v577_v22 = vld [vmem:[%s442_s12] sm:$0xff]  ;;  %v578_v23 = vld [vmem:[%s442_s12 + $0x8] sm:$0xff]  ;;  %v559_v26 = vmul.f32 0.5, %v553_v16  ;;  %s906_s15 = sshll.u32 %s1318_s29, 4  ;;  %v556_v27 = vand.u32 2147483647, %v554_v19 }
  0x9f   : > { %v525_v6 = vmul.u32 128, %v521_v3  ;;  %v527_v7 = vadd.s32 %v526_v2, %v524_v5  ;;  %v538_v8 = vadd.s32 %v524_v5, %v523_v4  ;;  %vm543_vm1 = vcmp.eq.s32.totalorder %v542_v12, 1  ;;  %s1590_s23 = scalar_lea.hbm %s1739_s5, %s906_s15  ;;  %s1599_s8 = scalar_lea.vmem [#allocation14], %s897_s0 }
  0xa0   : > { %v560_v28 = vmul.f32 0.5, %v554_v19  ;;  %v579_v30 = vsub.f32 %v575_v18, %v577_v22  ;;  %vm1592_vm4 = vcmp.lt.f32.partialorder %v555_v25, 1.0  ;;  %v561_v32 = vmul.f32 %v559_v26, %v553_v16  ;;  %s643_s18 = sshll.u32 %s1599_s8, 4  ;;  %s608_s30 = scalar_lea.sflag [#allocation6], %s1567_s10  ;;  %s1641_s18 = int_to_ptr.vmem [resolvable:$true] %s643_s18 }
  0xa1   : > { %v528_v13 = vadd.s32 %v526_v2, %v525_v6  ;;  %v1574_v14 = vadd.s32 %v527_v7, %v523_v4  ;;  %vm539_vm0 = vcmp.lt.s32.totalorder %v538_v8, 2  ;;  %v900_v33 = vadd.f32 -0.5, %v555_v25  ;;  %s1157_s21 = scalar_lea.vmem %s1578_s16, 16  ;;  %p1773_p9 = scmp.ne.s32.totalorder %s1761_s17, 0 }
  0xa2   : > { %vm544_vm3 = vmand %vm543_vm1, %vm539_vm0  ;;  %vm1604_vm6 = vcmp.lt.f32.partialorder %v556_v27, 1.0  ;;  %v562_v35 = vmul.f32 %v560_v28, %v554_v19  ;;  %v901_v36 = vadd.f32 -0.5, %v556_v27  ;;  %v580_v37 = vsub.f32 %v576_v21, %v578_v23  ;;  %p1158_p8 = scmp.ne.s32.totalorder %s1578_s16, %s1157_s21  ;;  %s1339_s19 = smov [#allocation13]  }
  0xa3   : > { %v1583_v24 = vadd.s32 %v528_v13, %v523_v4  ;;  %vm567_vm2 = vcmp.lt.s32.totalorder %v1574_v14, 1536  ;;  %v546_v29 = vsel %vm544_vm3, %v545_v20, 0.0  ;;  %s1161_s14 = sshll.u32 %s1339_s19, 4  ;;  %s1162_s14 = int_to_ptr.vmem [resolvable:$false] %s1161_s14 }
  0xa4   : > { %547 = vst [vmem:[%s482_s13] sm:$0x1] %v546_v29  ;;  %p1159_p10 = pnand %p1158_p8, %p1773_p9  ;;  %s1163_s9 = scalar_lea.vmem %s1162_s14, 32 }
  0xa5   : > { %vm568_vm5 = vcmp.lt.s32.totalorder %v1583_v24, 1536  ;;  %p1164_p13 = scmp.lt.s32.totalorder %s1578_s16, %s1162_s14  ;;  %p1165_p1 = scmp.lt.s32.totalorder %s1163_s9, %s1157_s21 }
  0xa6   : > { %p1160_p11 = pneg %p1159_p10 }
  0xa7   : > { %p1166_p4 = por %p1165_p1, %p1164_p13 }
  0xa9   : > { %p1167_p5 = pnand %p1166_p4, %p1160_p11 }
  0xab   : > { %1170 = shalt.err (!%p1167_p5)
}
  0xac   : > { %s1171_s20 = scalar_lea.hbm %s1590_s23, 16  ;;  %s1175_s12 = scalar_lea.hbm %s1739_s5, 32 }
  0xad   : > { %p1172_p6 = scmp.ne.s32.totalorder %s1590_s23, %s1171_s20  ;;  %p1176_p3 = scmp.lt.s32.totalorder %s1590_s23, %s1739_s5 }
  0xae   : > { %p1177_p7 = scmp.lt.s32.totalorder %s1175_s12, %s1171_s20 }
  0xaf   : > { %p1173_p12 = pnand %p1172_p6, %p1773_p9 }
  0xb0   : > { %p1178_p2 = por %p1177_p7, %p1176_p3 }
  0xb1   : > { %p1174_p0 = pneg %p1173_p12 }
  0xb3   : > { %p1179_p8 = pnand %p1178_p2, %p1174_p0 }
  0xb5   : > { %1182 = shalt.err (!%p1179_p8)
}
  0xb6   : > { %925 = dma.vmem_to_hbm [thread:$0]  (%p1773_p9), %s1578_s16, 16, %s1590_s23, %s608_s30   ;;  %v565_v38 = vsel %vm1592_vm4, %v561_v32, %v900_v33  ;;  %v581_v39 = vand.u32 2147483647, %v579_v30  ;;  %v585_v40 = vmul.f32 0.5, %v579_v30  ;;  %vm593_vm7 = vcmp.lt.s32.totalorder %v1574_v14, 1024 }
  0xb7   : > { %s907_s11 = sshll.u32 %s1318_s29, 7  ;;  %v566_v41 = vsel %vm1604_vm6, %v562_v35, %v901_v36  ;;  %v569_v42 = vsel %vm567_vm2, %v565_v38, 0.0  ;;  %v582_v43 = vand.u32 2147483647, %v580_v37  ;;  %v586_v44 = vmul.f32 0.5, %v580_v37  ;;  %s1653_s21 = scalar_lea.vmem [#allocation16], %s897_s0 }
  0xb8   : > { %v570_v45 = vsel %vm568_vm5, %v566_v41, 0.0  ;;  %vm583_vm8 = vcmp.lt.f32.partialorder %v581_v39, 1.0  ;;  %v587_v46 = vmul.f32 %v585_v40, %v579_v30  ;;  %v902_v47 = vadd.f32 -0.5, %v581_v39  ;;  %s1648_s30 = scalar_lea.hbm %s1740_s6, %s907_s11  ;;  %s656_s19 = sshll.u32 %s1653_s21, 4  ;;  %s657_s19 = int_to_ptr.vmem [resolvable:$true] %s656_s19 }
  0xb9   : > { %v571_v48 = vadd.f32 %v570_v45, %v569_v42  ;;  %vm584_vm9 = vcmp.lt.f32.partialorder %v582_v43, 1.0  ;;  %v588_v49 = vmul.f32 %v586_v44, %v580_v37  ;;  %v903_v50 = vadd.f32 -0.5, %v582_v43  ;;  %s612_s14 = scalar_lea.sflag [#allocation15], %s1547_s26  ;;  %s1183_s9 = scalar_lea.vmem %s1641_s18, 128 }
  0xba   : > { %v591_v51 = vsel %vm583_vm8, %v587_v46, %v902_v47  ;;  %vm594_vm10 = vcmp.lt.s32.totalorder %v1583_v24, 1024  ;;  %p1184_p10 = scmp.ne.s32.totalorder %s1641_s18, %s1183_s9  ;;  %s1340_s20 = smov [#allocation14]  }
  0xbb   : > { %604 = vst [vmem:[%s1599_s8] sm:$0xff] %v571_v48  ;;  %v592_v52 = vsel %vm584_vm9, %v588_v49, %v903_v50  ;;  %v595_v53 = vsel %vm593_vm7, %v591_v51, 0.0  ;;  %s1187_s22 = sshll.u32 %s1340_s20, 4  ;;  %s1188_s22 = int_to_ptr.vmem [resolvable:$false] %s1187_s22 }
  0xbc   : > { %v596_v54 = vsel %vm594_vm10, %v592_v52, 0.0  ;;  %p1185_p11 = pnand %p1184_p10, %p1773_p9  ;;  %s1189_s10 = scalar_lea.vmem %s1188_s22, 256 }
  0xbd   : > { %p1190_p1 = scmp.lt.s32.totalorder %s1641_s18, %s1188_s22  ;;  %p1191_p4 = scmp.lt.s32.totalorder %s1189_s10, %s1183_s9 }
  0xbe   : > { %p1186_p13 = pneg %p1185_p11 }
  0xbf   : > { %p1192_p5 = por %p1191_p4, %p1190_p1 }
  0xc1   : > { %p1193_p6 = pnand %p1192_p5, %p1186_p13 }
  0xc3   : > { %1196 = shalt.err (!%p1193_p6)
}
  0xc4   : > { %s1197_s0 = scalar_lea.hbm %s1648_s30, 128  ;;  %s1201_s12 = scalar_lea.hbm %s1740_s6, 256 }
  0xc5   : > { %p1198_p12 = scmp.ne.s32.totalorder %s1648_s30, %s1197_s0  ;;  %p1202_p7 = scmp.lt.s32.totalorder %s1648_s30, %s1740_s6 }
  0xc6   : > { %p1203_p2 = scmp.lt.s32.totalorder %s1201_s12, %s1197_s0 }
  0xc7   : > { %p1199_p0 = pnand %p1198_p12, %p1773_p9 }
  0xc8   : > { %p1204_p8 = por %p1203_p2, %p1202_p7 }
  0xc9   : > { %p1200_p3 = pneg %p1199_p0 }
  0xcb   : > { %p1205_p10 = pnand %p1204_p8, %p1200_p3 }
  0xcd   : > { %1208 = shalt.err (!%p1205_p10)
}
  0xce   : > { %926 = dma.vmem_to_hbm [thread:$0]  (%p1773_p9), %s1641_s18, 128, %s1648_s30, %s612_s14   ;;  %v597_v55 = vadd.f32 %v596_v54, %v595_v53 }
  0xcf   : > { %s654_s9 = scalar_lea.hbm %s1741_s7, %s907_s11  ;;  %s1209_s20 = scalar_lea.vmem %s657_s19, 128 }
  0xd0   : > { %606 = vst [vmem:[%s1653_s21] sm:$0xff] %v597_v55  ;;  %p1210_p11 = scmp.ne.s32.totalorder %s657_s19, %s1209_s20  ;;  %s1341_s22 = smov [#allocation16]  }
  0xd1   : > { %s1213_s10 = sshll.u32 %s1341_s22, 4  ;;  %s1214_s10 = int_to_ptr.vmem [resolvable:$false] %s1213_s10 }
  0xd2   : > { %p1211_p13 = pnand %p1210_p11, %p1773_p9  ;;  %s1215_s0 = scalar_lea.vmem %s1214_s10, 256 }
  0xd3   : > { %p1216_p4 = scmp.lt.s32.totalorder %s657_s19, %s1214_s10  ;;  %p1217_p5 = scmp.lt.s32.totalorder %s1215_s0, %s1209_s20 }
  0xd4   : > { %p1212_p1 = pneg %p1211_p13 }
  0xd5   : > { %p1218_p6 = por %p1217_p5, %p1216_p4 }
  0xd7   : > { %p1219_p12 = pnand %p1218_p6, %p1212_p1 }
  0xd9   : > { %1222 = shalt.err (!%p1219_p12)
}
  0xda   : > { %s1223_s29 = scalar_lea.hbm %s654_s9, 128  ;;  %s1227_s30 = scalar_lea.hbm %s1741_s7, 256 }
  0xdb   : > { %p1224_p0 = scmp.ne.s32.totalorder %s654_s9, %s1223_s29  ;;  %p1228_p2 = scmp.lt.s32.totalorder %s654_s9, %s1741_s7 }
  0xdc   : > { %p1229_p8 = scmp.lt.s32.totalorder %s1227_s30, %s1223_s29 }
  0xdd   : > { %p1225_p3 = pnand %p1224_p0, %p1773_p9 }
  0xde   : > { %p1230_p10 = por %p1229_p8, %p1228_p2 }
  0xdf   : > { %p1226_p7 = pneg %p1225_p3 }
  0xe1   : > { %p1231_p11 = pnand %p1230_p10, %p1226_p7 }
  0xe3   : > { %1234 = shalt.err (!%p1231_p11)
}
  0xe4   : > { %927 = dma.vmem_to_hbm [thread:$0]  (%p1773_p9), %s657_s19, 128, %s654_s9, %s612_s14  }
  0xe5 PF: > { %s1774_s13 = sld [smem:[#allocation27_spill]]  ;;  %s668_s15 = sand.u32 1, %s1298_s24  }
  0xe6   : > { %s1775_s12 = sld [smem:[#allocation24_spill]]  ;;  %s669_s27 = scalar_lea.sflag [#allocation6], %s668_s15 }
  0xeb   : > { %p1776_p13 = scmp.ne.s32.totalorder %s1774_s13, 0 }
  0xec   : > { %p1777_p1 = scmp.ge.s32.totalorder %s1775_s12, 2 }
  0xee   : > { %p936_p4 = pnand %p1777_p1, %p1776_p13 }
  0xf0   : > { %p937_p5 = pneg %p936_p4 }
  0xf2   : > { %1284 = dma.done.wait (%p937_p5), %s669_s27, 16  }
  0xf3   : > { %1286 = vsyncadd (%p937_p5), %s669_s27, 4294967280  ;;  %s1778_s16 = sadd.s32 4294967294, %s1775_s12  }
  0xf4   : > { %s676_s23 = sand.u32 1, %s1778_s16  }
  0xf5   : > { %s677_s20 = scalar_lea.sflag [#allocation15], %s676_s23 }
  0xf6   : > { %1288 = dma.done.wait (%p937_p5), %s677_s20, 256  }
  0xf7   : > { %1290 = vsyncadd (%p937_p5), %s677_s20, 4294967040  ;;  %s31_s8 = sadd.s32 1, %s1775_s12   ;;  %s1779_s17 = sld [smem:[#allocation22_spill]] }
  0xf8   : > { %p28_p9 = scmp.ge.s32.totalorder %s31_s8, 4   ;;  %s1780_s26 = sld [smem:[#allocation26_spill]] }
  0xf9   : > { %s1781_s29 = sld [smem:[#allocation23_spill]]  ;;  %s1783_s24 = smov %s1302_s25 }
  0xfa   : > { %s1782_s30 = sld [smem:[#allocation25_spill]]  ;;  %s1785_s27 = smov %s1314_s28 }
  0xfb   : > { %s1724_s28 = smov 0   ;;  %30 = sbr.rel (!%p28_p9) target bundleno = 14 (0xe), region = 165 }
  0xfd   : > { %s1784_s25 = smov %s1779_s17 }
 0x100   :  { %691 = vsyncpa [#allocation5], 1 }
 0x101   :  { %693 = vsyncpa [#allocation5 + $0x1], 1 }
 0x102   :  { %694 = vsyncpa [#allocation8], 1 }
 0x103   :  { %696 = vsyncpa [#allocation8 + $0x1], 1 }
 0x104   :  { %697 = vsyncpa [#allocation11], 1 }
 0x105   :  { %699 = vsyncpa [#allocation11 + $0x1], 1 }
 0x106   :  { %700 = vsyncpa [#allocation6], 1 }
 0x107   :  { %702 = vsyncpa [#allocation6 + $0x1], 1 }
 0x108   :  { %703 = vsyncpa [#allocation15], 1 }
 0x109   :  { %705 = vsyncpa [#allocation15 + $0x1], 1 }

</bundles_post_ra>
